<compile_context>
chip_gen: v6e
topology: v6e:2x2x1
jax: 0.10.0
libtpu: 0.0.40
codegen_flags: <defaults>
</compile_context>

<pallas_src>
import numpy as np
import jax
import jax.numpy as jnp
from jax import lax
from jax.experimental import pallas as pl
from jax.experimental.pallas import tpu as pltpu

# --- TrellisLinear default config (from the PyTorch module __init__) ---------
T = 256          # trellis vector length
L = 16           # trellis state bits
V = 2            # values emitted per trellis step
K = 2            # bits per weight
INPUT_QBITS = 8  # InputQuantizerParams(bit_width=8, group_mode='PER_CHANNEL', use_offset=True)
WEIGHT_SCALES_GROUP_SIZE = 256


# ------------------------------------------------------------------ utilities
def _hadamard(n: int) -> np.ndarray:
    """Normalized Sylvester Hadamard matrix (n must be a power of two)."""
    H = np.array([[1.0]], dtype=np.float64)
    while H.shape[0] < n:
        H = np.block([[H, H], [H, -H]])
    return (H / np.sqrt(n)).astype(np.float32)


def reconstruct_weight_from_trellis(trellis, weight_shape):
    """Bitshift-trellis decode (glue; parameter materialization, not the matmul hot path).

    trellis: (out*in // T, T // 16 * K) uint16  ->  (out, in) float32
    """
    # TODO(synk): exact TrellisQuantizer 'LowBitSym' codebook / initial-state convention is not
    # available in the reference; the bitshift-trellis structure (L=16, K=2, V=2) is implemented
    # with a deterministic symmetric low-bit surrogate codebook.
    out_f, in_f = weight_shape
    num_vec, words = trellis.shape
    t = trellis.astype(jnp.uint32)
    shifts = jnp.arange(15, -1, -1, dtype=jnp.uint32)                 # MSB-first
    bits = (t[:, :, None] >> shifts[None, None, :]) & jnp.uint32(1)
    bits = bits.reshape(num_vec, words * 16)                          # (num_vec, T*K)

    nsteps = T // V                                                   # 128 steps/vector
    bits_per_step = K * V                                             # 4 bits/step
    step_bits = bits.reshape(num_vec, nsteps, bits_per_step)
    pow2 = jnp.array([1 << i for i in range(bits_per_step - 1, -1, -1)], dtype=jnp.uint32)
    step_vals = jnp.sum(step_bits * pow2[None, None, :], axis=-1).astype(jnp.uint32)

    def scan_fn(state, b):
        state = ((state << bits_per_step) | b) & jnp.uint32((1 << L) - 1)
        return state, state

    _, states = lax.scan(scan_fn, jnp.zeros((num_vec,), jnp.uint32), step_vals.T)
    states = states.T                                                 # (num_vec, nsteps)

    hi = ((states >> 8) & jnp.uint32(0xFF)).astype(jnp.float32)
    lo = (states & jnp.uint32(0xFF)).astype(jnp.float32)
    v0 = (hi - 127.5) / 127.5                                         # symmetric in [-1, 1]
    v1 = (lo - 127.5) / 127.5
    vecs = jnp.stack([v0, v1], axis=-1).reshape(num_vec, T)           # V=2 values per step
    return vecs.reshape(out_f, in_f)


# ------------------------------------------------------------------ Pallas kernels
def hadamard_left_kernel(h_ref, w_ref, o_ref, acc_ref):
    """tmp = (diag(SV) @ H_out) @ W_rec — tiled (out, in, out-reduction) with f32 accumulator."""
    # TODO(synk): incoherence_process source not provided; standard QTIP-style randomized
    # Hadamard de-rotation (normalized Hadamards, +-1 sign vectors pre-folded) is used.
    # TODO(synk): for very large dims, replace the dense Hadamard matmul with a blocked FWHT.
    @pl.when(pl.program_id(2) == 0)
    def _():
        acc_ref[...] = jnp.zeros_like(acc_ref)

    acc_ref[...] += jnp.dot(h_ref[...], w_ref[...], preferred_element_type=jnp.float32)

    @pl.when(pl.program_id(2) == pl.num_programs(2) - 1)
    def _():
        o_ref[...] = acc_ref[...].astype(o_ref.dtype)


def hadamard_right_scale_kernel(t_ref, h_ref, scl_ref, o_ref, acc_ref):
    """W = tmp @ (H_in @ diag(SU)), then per-(row, 256-col-group) weight scales; bf16 output."""
    k = pl.program_id(1)

    @pl.when(k == 0)
    def _():
        acc_ref[...] = jnp.zeros_like(acc_ref)

    acc_ref[...] += jnp.dot(t_ref[...], h_ref[...], preferred_element_type=jnp.float32)

    @pl.when(k == pl.num_programs(1) - 1)
    def _():
        tm, in_f = acc_ref.shape
        g = in_f // WEIGHT_SCALES_GROUP_SIZE
        scl = scl_ref[...]                                            # (tm, g) compact group scales
        w = acc_ref[...].reshape(tm, g, WEIGHT_SCALES_GROUP_SIZE) * scl[:, :, None]
        o_ref[...] = w.reshape(tm, in_f).astype(o_ref.dtype)


def quant_linear_kernel(x_ref, w_ref, o_ref, acc_ref):
    """InputQuantizer (dynamic 8-bit per-channel asymmetric fake-quant) fused with x @ W.T.

    W is consumed as (out, in): the dot contracts the last dims of both operands, so no
    transpose of W is ever materialized.  M is NOT tiled, so per-channel min/max stats are exact.
    """
    # TODO(synk): InputQuantizer source not provided; implemented as dynamic per-input-channel
    # asymmetric 8-bit fake quantization (use_offset=True), which matches its declared params.
    k = pl.program_id(1)

    @pl.when(k == 0)
    def _():
        acc_ref[...] = jnp.zeros_like(acc_ref)

    x = x_ref[...]                                                    # (M, tk) f32 — quant math in f32 (v5e-safe)
    qmax = float(2 ** INPUT_QBITS - 1)
    xmin = jnp.min(x, axis=0, keepdims=True)                          # per-channel stats over all M rows
    xmax = jnp.max(x, axis=0, keepdims=True)
    rng = xmax - xmin
    scale = jnp.where(rng > 0.0, rng / qmax, jnp.ones_like(rng))
    zp = jnp.round(-xmin / scale)
    xq = jnp.clip(jnp.round(x / scale) + zp, 0.0, qmax)
    xdq = jnp.where(rng > 0.0, (xq - zp) * scale, x)                  # degenerate channels pass through

    acc_ref[...] += lax.dot_general(
        xdq.astype(jnp.bfloat16), w_ref[...],
        dimension_numbers=(((1,), (1,)), ((), ())),                   # contract `in` of both -> x @ W.T
        preferred_element_type=jnp.float32)

    @pl.when(k == pl.num_programs(1) - 1)
    def _():
        o_ref[...] = acc_ref[...].astype(o_ref.dtype)


# ------------------------------------------------------------------ wrapper
def _pick_tile(dim, pref):
    """Largest power-of-two-friendly divisor of `dim` that is <= pref (MXU-aligned preference)."""
    t = min(dim, pref)
    while dim % t:
        t //= 2
    return max(t, 1)


def trellis_linear_forward(x, params):
    out_f, in_f = params["weight_shape"]
    b, s, _ = x.shape
    m = b * s
    x2d = x.reshape(m, in_f).astype(jnp.float32)

    # --- weight reconstruction from packed trellis (glue) ---
    # TODO(synk): if the weights are static across forward calls, cache the processed W
    # (everything up to and including the two weight kernels below) outside the per-call path.
    w_rec = reconstruct_weight_from_trellis(params["trellis"], (out_f, in_f)).astype(jnp.bfloat16)

    # Pre-fold the +-1 sign vectors into the static Hadamards: diag(SV)·H_out and H_in·diag(SU).
    sv = params["SV"].astype(jnp.float32)
    su = params["SU"].astype(jnp.float32)
    h_out_sv = (params["h_out"] * sv[:, None]).astype(jnp.bfloat16)   # (out, out)
    h_in_su = (params["h_in"] * su[None, :]).astype(jnp.bfloat16)     # (in, in)

    groups_per_row = in_f // WEIGHT_SCALES_GROUP_SIZE
    scl = params["weight_scales"].astype(jnp.float32).reshape(out_f, groups_per_row)  # compact

    # --- Pallas kernel 1: tmp = (diag(SV) H_out) @ W_rec  (tiled, bf16 out) ---
    tm = _pick_tile(out_f, 256)
    tn = _pick_tile(in_f, 256)
    tk = _pick_tile(out_f, 256)
    tmp = pl.pallas_call(
        hadamard_left_kernel,
        out_shape=jax.ShapeDtypeStruct((out_f, in_f), jnp.bfloat16),
        grid_spec=pltpu.PrefetchScalarGridSpec(
            num_scalar_prefetch=0,
            grid=(out_f // tm, in_f // tn, out_f // tk),
            in_specs=[pl.BlockSpec((tm, tk), lambda i, j, k: (i, k)),
                      pl.BlockSpec((tk, tn), lambda i, j, k: (k, j))],
            out_specs=pl.BlockSpec((tm, tn), lambda i, j, k: (i, j)),
            scratch_shapes=[pltpu.VMEM((tm, tn), jnp.float32)]),
        compiler_params=pltpu.CompilerParams(
            dimension_semantics=("parallel", "parallel", "arbitrary")),
    )(h_out_sv, w_rec)

    # --- Pallas kernel 2: W = tmp @ (H_in diag(SU)) * group scales  (tiled over out & reduction) ---
    tm2 = _pick_tile(out_f, 256)
    tk2 = _pick_tile(in_f, 512)
    w = pl.pallas_call(
        hadamard_right_scale_kernel,
        out_shape=jax.ShapeDtypeStruct((out_f, in_f), jnp.bfloat16),
        grid_spec=pltpu.PrefetchScalarGridSpec(
            num_scalar_prefetch=0,
            grid=(out_f // tm2, in_f // tk2),
            in_specs=[pl.BlockSpec((tm2, tk2), lambda i, k: (i, k)),
                      pl.BlockSpec((tk2, in_f), lambda i, k: (k, 0)),
                      pl.BlockSpec((tm2, groups_per_row), lambda i, k: (i, 0))],
            out_specs=pl.BlockSpec((tm2, in_f), lambda i, k: (i, 0)),
            scratch_shapes=[pltpu.VMEM((tm2, in_f), jnp.float32)]),
        compiler_params=pltpu.CompilerParams(
            dimension_semantics=("parallel", "arbitrary")),
    )(tmp, h_in_su, scl)

    # --- Pallas kernel 3: input fake-quant fused with out = x @ W.T (W stays (out, in)) ---
    tn3 = _pick_tile(out_f, 256)
    tk3 = _pick_tile(in_f, 512)
    out2d = pl.pallas_call(
        quant_linear_kernel,
        out_shape=jax.ShapeDtypeStruct((m, out_f), jnp.float32),
        grid_spec=pltpu.PrefetchScalarGridSpec(
            num_scalar_prefetch=0,
            grid=(out_f // tn3, in_f // tk3),
            in_specs=[pl.BlockSpec((m, tk3), lambda j, k: (0, k)),
                      pl.BlockSpec((tn3, tk3), lambda j, k: (j, k))],
            out_specs=pl.BlockSpec((m, tn3), lambda j, k: (0, j)),
            scratch_shapes=[pltpu.VMEM((m, tn3), jnp.float32)]),
        compiler_params=pltpu.CompilerParams(
            dimension_semantics=("parallel", "arbitrary")),
    )(x2d, w)

    return out2d.reshape(b, s, out_f)


# ------------------------------------------------------------------ main
if __name__ == "__main__":
    out_features, in_features = 128, 256   # weight_shape; in_features must be a multiple of 256
    batch, seq = 2, 8

    key = jax.random.PRNGKey(0)
    k_su, k_sv, k_scl, k_tr, k_x = jax.random.split(key, 5)

    # Deterministic synthetic parameters matching __init__ shapes/dtypes.
    SU = jnp.where(jax.random.bernoulli(k_su, 0.5, (in_features,)), 1.0, -1.0).astype(jnp.float16)
    SV = jnp.where(jax.random.bernoulli(k_sv, 0.5, (out_features,)), 1.0, -1.0).astype(jnp.float16)
    n_groups = out_features * in_features // WEIGHT_SCALES_GROUP_SIZE
    weight_scales = (0.5 + jax.random.uniform(k_scl, (n_groups, 1))).astype(jnp.float16)
    trellis_shape = (out_features * in_features // T, T // 16 * K)
    trellis = jax.random.randint(k_tr, trellis_shape, 0, 65536, dtype=jnp.int32).astype(jnp.uint16)

    params = dict(
        weight_shape=(out_features, in_features),
        SU=SU, SV=SV,
        weight_scales=weight_scales,
        trellis=trellis,
        h_out=jnp.asarray(_hadamard(out_features)),
        h_in=jnp.asarray(_hadamard(in_features)),
    )

    x = jax.random.normal(k_x, (batch, seq, in_features), dtype=jnp.float32)

    out = trellis_linear_forward(x, params)
    jax.block_until_ready(out)
    assert out.shape == (batch, seq, out_features)
    print("KERNEL_OK")
</pallas_src>

<mosaic_0001>
module attributes {stable_mosaic.version = 11 : i64} {
  func.func @hadamard_left_kernel(%arg0: i32, %arg1: i32, %arg2: i32, %arg3: memref<128x128xbf16, #tpu.memory_space<vmem>>, %arg4: memref<128x256xbf16, #tpu.memory_space<vmem>>, %arg5: memref<128x256xbf16, #tpu.memory_space<vmem>>, %arg6: memref<128x256xf32, #tpu.memory_space<vmem>>) attributes {dimension_semantics = [#tpu.dimension_semantics<parallel>, #tpu.dimension_semantics<parallel>, #tpu.dimension_semantics<arbitrary>], iteration_bounds = array<i64: 1, 1, 1>, scalar_prefetch = 0 : i64, scratch_operands = 1 : i64, tpu.core_type = #tpu.core_type<tc>, window_params = [{transform_indices = @transform_0, window_bounds = array<i64: 128, 128>}, {transform_indices = @transform_1, window_bounds = array<i64: 128, 256>}, {transform_indices = @transform_2, window_bounds = array<i64: 128, 256>}]} {
    %c0_i32 = arith.constant 0 : i32
    %0 = arith.cmpi eq, %arg2, %c0_i32 : i32
    %1 = arith.extui %0 : i1 to i32
    %c0_i32_0 = arith.constant 0 : i32
    %2 = arith.cmpi ne, %1, %c0_i32_0 : i32
    scf.if %2 {
      %cst_10 = arith.constant 0.000000e+00 : f32
      %12 = vector.broadcast %cst_10 : f32 to vector<128x256xf32>
      %c0_11 = arith.constant 0 : index
      %c0_12 = arith.constant 0 : index
      %13 = vector.load %arg6[%c0_11, %c0_12] : memref<128x256xf32, #tpu.memory_space<vmem>>, vector<128x256xf32>
      tpu.vector_store %arg6[%c0_11, %c0_12], %12 {strides = array<i32>} : memref<128x256xf32, #tpu.memory_space<vmem>>, vector<128x256xf32>,
    } else {
    }
    %c0 = arith.constant 0 : index
    %c0_1 = arith.constant 0 : index
    %3 = vector.load %arg6[%c0, %c0_1] : memref<128x256xf32, #tpu.memory_space<vmem>>, vector<128x256xf32>
    %c0_2 = arith.constant 0 : index
    %c0_3 = arith.constant 0 : index
    %4 = vector.load %arg3[%c0_2, %c0_3] : memref<128x128xbf16, #tpu.memory_space<vmem>>, vector<128x128xbf16>
    %c0_4 = arith.constant 0 : index
    %c0_5 = arith.constant 0 : index
    %5 = vector.load %arg4[%c0_4, %c0_5] : memref<128x256xbf16, #tpu.memory_space<vmem>>, vector<128x256xbf16>
    %cst = arith.constant dense<0.000000e+00> : vector<128x256xf32>
    %6 = tpu.matmul %4, %5, %cst {dimension_numbers = #tpu.dot_dimension_numbers<[1], [0], [0], [1], [0, 0, 1, 1], [], []>} : vector<128x128xbf16>, vector<128x256xbf16>, vector<128x256xf32> -> vector<128x256xf32>
    %7 = arith.addf %3, %6 : vector<128x256xf32>
    %c0_6 = arith.constant 0 : index
    %c0_7 = arith.constant 0 : index
    %8 = vector.load %arg6[%c0_6, %c0_7] : memref<128x256xf32, #tpu.memory_space<vmem>>, vector<128x256xf32>
    tpu.vector_store %arg6[%c0_6, %c0_7], %7 {strides = array<i32>} : memref<128x256xf32, #tpu.memory_space<vmem>>, vector<128x256xf32>,
    %c0_i32_8 = arith.constant 0 : i32
    %9 = arith.cmpi eq, %arg2, %c0_i32_8 : i32
    %10 = arith.extui %9 : i1 to i32
    %c0_i32_9 = arith.constant 0 : i32
    %11 = arith.cmpi ne, %10, %c0_i32_9 : i32
    scf.if %11 {
      %c0_10 = arith.constant 0 : index
      %c0_11 = arith.constant 0 : index
      %12 = vector.load %arg6[%c0_10, %c0_11] : memref<128x256xf32, #tpu.memory_space<vmem>>, vector<128x256xf32>
      %13 = arith.truncf %12 : vector<128x256xf32> to vector<128x256xbf16>
      %c0_12 = arith.constant 0 : index
      %c0_13 = arith.constant 0 : index
      %14 = vector.load %arg5[%c0_12, %c0_13] : memref<128x256xbf16, #tpu.memory_space<vmem>>, vector<128x256xbf16>
      tpu.vector_store %arg5[%c0_12, %c0_13], %13 {strides = array<i32>} : memref<128x256xbf16, #tpu.memory_space<vmem>>, vector<128x256xbf16>,
    } else {
    }
    return
  }
  func.func @transform_0(%arg0: i32, %arg1: i32, %arg2: i32) -> (i32, i32) {
    %c0_i32 = arith.constant 0 : i32
    return %arg0, %arg2 : i32, i32
  }
  func.func @transform_1(%arg0: i32, %arg1: i32, %arg2: i32) -> (i32, i32) {
    %c0_i32 = arith.constant 0 : i32
    return %arg2, %arg1 : i32, i32
  }
  func.func @transform_2(%arg0: i32, %arg1: i32, %arg2: i32) -> (i32, i32) {
    %c0_i32 = arith.constant 0 : i32
    return %arg0, %arg1 : i32, i32
  }
}

</mosaic_0001>

<bundles_post_ra>
// kernel: tpu_custom_call.1
= control target key start
LH: loop header
LB: loop body
LE: loop exit
PB: predicated region body
PF: predicated region fallthrough
CT: control target
= control target key end

     0   :  { %7 = vsyncpa [#allocation4], 0  ;;  %s835_s0 = inlined_call_operand.hbm [shape: bf16[128,128], index: 0, kind: input, shape index: {}]   ;;  %s836_s1 = inlined_call_operand.hbm [shape: bf16[128,256], index: 1, kind: input, shape index: {}]   ;;  %s837_s2 = inlined_call_operand.hbm [shape: bf16[128,256], index: 2, kind: output, shape index: {}]  }
   0x1   :  { %8 = vsyncpa [#allocation7], 0 }
   0x2   :  { %9 = vsyncpa [#allocation5], 0  ;;  %s789_s9 = smov [#allocation3]  }
   0x3   :  { %s15_s10 = sshll.u32 %s789_s9, 4  ;;  %s16_s10 = int_to_ptr.vmem [resolvable:$true] %s15_s10 }
   0x4   :  { %s731_s11 = scalar_lea.vmem %s16_s10, 1024  ;;  %p736_p1 = scmp.lt.s32.totalorder %s16_s10, %s16_s10 }
   0x5   :  { %p732_p0 = scmp.ne.s32.totalorder %s16_s10, %s731_s11  ;;  %p737_p2 = scmp.lt.s32.totalorder %s731_s11, %s731_s11 }
   0x7   :  { %p738_p3 = por %p737_p2, %p736_p1 }
   0x9   :  { %p739_p4 = pnand %p738_p3, %p732_p0 }
   0xb   :  { %742 = shalt.err (!%p739_p4)
}
   0xc   :  { %s790_s12 = smov 64   ;;  %s791_s13 = smov 4  }
   0xd   :  { %21 = dma.hbm_to_vmem [thread:$0]  %s835_s0, 1024, %s16_s10, [#allocation4], %s790_s12, %s790_s12, %s791_s13  }
   0xe   :  { %s792_s16 = smov [#allocation6]  }
   0xf   :  { %s27_s17 = sshll.u32 %s792_s16, 4  ;;  %s28_s17 = int_to_ptr.vmem [resolvable:$true] %s27_s17 }
  0x10   :  { %s751_s18 = scalar_lea.vmem %s28_s17, 2048  ;;  %p756_p6 = scmp.lt.s32.totalorder %s28_s17, %s28_s17 }
  0x11   :  { %p752_p5 = scmp.ne.s32.totalorder %s28_s17, %s751_s18  ;;  %p757_p7 = scmp.lt.s32.totalorder %s751_s18, %s751_s18 }
  0x13   :  { %p758_p8 = por %p757_p7, %p756_p6 }
  0x15   :  { %p759_p9 = pnand %p758_p8, %p752_p5 }
  0x17   :  { %762 = shalt.err (!%p759_p9)
}
  0x18   :  { %s793_s19 = smov 128   ;;  %s794_s20 = smov 8  }
  0x19   :  { %33 = dma.hbm_to_vmem [thread:$0]  %s836_s1, 2048, %s28_s17, [#allocation7], %s793_s19, %s793_s19, %s794_s20  }
  0x1a   :  { %783 = dma.done.wait [#allocation4], 1024  }
  0x1b   :  { %784 = vsyncadd [#allocation4], 4294966272 }
  0x1c   :  { %785 = dma.done.wait [#allocation7], 2048  }
  0x1d   :  { %786 = vsyncadd [#allocation7], 4294965248  ;;  %v795_v0 = vmov 0   ;;  %v691_v1 = vld [vmem:[#allocation6 + $0x74] ss:$8 sps:$4 sm:$0xff]   ;;  %v715_v17 = vld [vmem:[#allocation3] sm:$0xff]  }
  0x1e   :  { %301 = vmatprep.mubr.bf16.mxu0 %v795_v0  ;;  %341 = vmatprep.mubr.bf16.mxu1 %v795_v0  ;;  %v693_v2 = vld [vmem:[#allocation6 + $0x70] ss:$8 sps:$4 sm:$0xff]   ;;  %v694_v3 = vld [vmem:[#allocation6 + $0x64] ss:$8 sps:$4 sm:$0xff]   ;;  %v696_v4 = vld [vmem:[#allocation6 + $0x60] ss:$8 sps:$4 sm:$0xff]  }
  0x1f   :  { %269 = vmatprep.subr.bf16.mxu0 %v691_v1  ;;  %667 = vmatprep.subr.bf16.mxu1 %v691_v1  ;;  %v697_v5 = vld [vmem:[#allocation6 + $0x54] ss:$8 sps:$4 sm:$0xff]   ;;  %v699_v6 = vld [vmem:[#allocation6 + $0x50] ss:$8 sps:$4 sm:$0xff]   ;;  %v700_v7 = vld [vmem:[#allocation6 + $0x44] ss:$8 sps:$4 sm:$0xff]  }
  0x20   :  { %270 = vmatpush1.bf16.msra.mxu0 %v693_v2  ;;  %675 = vmatpush1.bf16.msra.mxu1 %v693_v2  ;;  %v702_v8 = vld [vmem:[#allocation6 + $0x40] ss:$8 sps:$4 sm:$0xff]   ;;  %v703_v9 = vld [vmem:[#allocation6 + $0x34] ss:$8 sps:$4 sm:$0xff]   ;;  %v705_v10 = vld [vmem:[#allocation6 + $0x30] ss:$8 sps:$4 sm:$0xff]  }
  0x21   :  { %271 = vmatprep.subr.bf16.mxu0 %v694_v3  ;;  %668 = vmatprep.subr.bf16.mxu1 %v694_v3  ;;  %v706_v11 = vld [vmem:[#allocation6 + $0x24] ss:$8 sps:$4 sm:$0xff]   ;;  %v708_v12 = vld [vmem:[#allocation6 + $0x20] ss:$8 sps:$4 sm:$0xff]   ;;  %v709_v13 = vld [vmem:[#allocation6 + $0x14] ss:$8 sps:$4 sm:$0xff]  }
  0x22   :  { %v711_v14 = vld [vmem:[#allocation6 + $0x10] ss:$8 sps:$4 sm:$0xff]   ;;  %v712_v15 = vld [vmem:[#allocation6 + $0x4] ss:$8 sps:$4 sm:$0xff]   ;;  %v714_v16 = vld [vmem:[#allocation6] ss:$8 sps:$4 sm:$0xff]  }
  0x23   :  { %v716_v18 = vld [vmem:[#allocation3 + $0x20] sm:$0xff]   ;;  %v717_v19 = vld [vmem:[#allocation3 + $0x8] sm:$0xff]   ;;  %v719_v21 = vld [vmem:[#allocation3 + $0x10] sm:$0xff]   ;;  %s796_s0 = smov [#allocation8]  }
  0x24   :  { %272 = vmatpush1.bf16.msra.mxu0 %v696_v4  ;;  %676 = vmatpush1.bf16.msra.mxu1 %v696_v4  ;;  %v718_v20 = vld [vmem:[#allocation3 + $0x28] sm:$0xff]   ;;  %v720_v22 = vld [vmem:[#allocation3 + $0x30] sm:$0xff]   ;;  %v721_v23 = vld [vmem:[#allocation3 + $0x18] sm:$0xff]   ;;  %s598_s1 = sshll.u32 %s796_s0, 4  ;;  %s599_s1 = int_to_ptr.vmem [resolvable:$true] %s598_s1 }
  0x25   :  { %273 = vmatprep.subr.bf16.mxu0 %v697_v5  ;;  %669 = vmatprep.subr.bf16.mxu1 %v697_v5  ;;  %v722_v24 = vld [vmem:[#allocation3 + $0x38] sm:$0xff]   ;;  %s763_s23 = scalar_lea.vmem %s599_s1, 2048  ;;  %p768_p11 = scmp.lt.s32.totalorder %s599_s1, %s599_s1 }
  0x26   :  { %p764_p10 = scmp.ne.s32.totalorder %s599_s1, %s763_s23  ;;  %p769_p12 = scmp.lt.s32.totalorder %s763_s23, %s763_s23 }
  0x28   :  { %274 = vmatpush1.bf16.msra.mxu0 %v699_v6  ;;  %677 = vmatpush1.bf16.msra.mxu1 %v699_v6  ;;  %p770_p13 = por %p769_p12, %p768_p11 }
  0x29   :  { %275 = vmatprep.subr.bf16.mxu0 %v700_v7  ;;  %670 = vmatprep.subr.bf16.mxu1 %v700_v7 }
  0x2a   :  { %p771_p0 = pnand %p770_p13, %p764_p10 }
  0x2c   :  { %276 = vmatpush1.bf16.msra.mxu0 %v702_v8  ;;  %678 = vmatpush1.bf16.msra.mxu1 %v702_v8 }
  0x2d   :  { %277 = vmatprep.subr.bf16.mxu0 %v703_v9  ;;  %671 = vmatprep.subr.bf16.mxu1 %v703_v9 }
  0x30   :  { %278 = vmatpush1.bf16.msra.mxu0 %v705_v10  ;;  %679 = vmatpush1.bf16.msra.mxu1 %v705_v10 }
  0x31   :  { %279 = vmatprep.subr.bf16.mxu0 %v706_v11  ;;  %672 = vmatprep.subr.bf16.mxu1 %v706_v11 }
  0x34   :  { %280 = vmatpush1.bf16.msra.mxu0 %v708_v12  ;;  %680 = vmatpush1.bf16.msra.mxu1 %v708_v12 }
  0x35   :  { %281 = vmatprep.subr.bf16.mxu0 %v709_v13  ;;  %673 = vmatprep.subr.bf16.mxu1 %v709_v13 }
  0x38   :  { %282 = vmatpush1.bf16.msra.mxu0 %v711_v14  ;;  %681 = vmatpush1.bf16.msra.mxu1 %v711_v14 }
  0x39   :  { %283 = vmatprep.subr.bf16.mxu0 %v712_v15  ;;  %674 = vmatprep.subr.bf16.mxu1 %v712_v15 }
  0x3c   :  { %284 = vmatpush1.bf16.msra.mxu0 %v714_v16  ;;  %682 = vmatpush1.bf16.msra.mxu1 %v714_v16 }
  0x3f   :  { %302 = vmatmul.mubr.bf16.vlgmr.msra.gmra.mxu0 %v715_v17  ;;  %342 = vmatmul.mubr.bf16.vlgmr.msra.gmra.mxu1 %v716_v18 }
  0x40   :  { %311 = vmatprep.mubr.bf16.mxu0 %v795_v0  ;;  %351 = vmatprep.mubr.bf16.mxu1 %v795_v0 }
  0x47   :  { %312 = vmatmul.mubr.bf16.gmra.mxu0 %v717_v19  ;;  %352 = vmatmul.mubr.bf16.gmra.mxu1 %v718_v20 }
  0x48   :  { %321 = vmatprep.mubr.bf16.mxu0 %v795_v0  ;;  %361 = vmatprep.mubr.bf16.mxu1 %v795_v0 }
  0x4f   :  { %322 = vmatmul.mubr.bf16.gmra.mxu0 %v719_v21  ;;  %362 = vmatmul.mubr.bf16.gmra.mxu1 %v720_v22 }
  0x50   :  { %331 = vmatprep.mubr.bf16.mxu0 %v795_v0  ;;  %371 = vmatprep.mubr.bf16.mxu1 %v795_v0 }
  0x57   :  { %332 = vmatmul.mubr.bf16.gmra.mxu0 %v721_v23  ;;  %372 = vmatmul.mubr.bf16.gmra.mxu1 %v722_v24 }
  0xff   :  { %v303_v25 = vpop.f32.mrf.mxu0  ;;  %v343_v26 = vpop.f32.mrf.mxu1 }
 0x101   :  { %v305_v27 = vpop.f32.mrf.mxu0  ;;  %v345_v28 = vpop.f32.mrf.mxu1 }
 0x102   :  { %v651_v29 = vpack.c.bf16 %v305_v27, %v303_v25  ;;  %v659_v30 = vpack.c.bf16 %v345_v28, %v343_v26 }
 0x103   :  { %v307_v31 = vpop.f32.mrf.mxu0  ;;  %v347_v32 = vpop.f32.mrf.mxu1 }
 0x104   :  { %577 = vst [vmem:[#allocation8] sm:$0xff] %v651_v29  ;;  %585 = vst [vmem:[#allocation8 + $0x40] sm:$0xff] %v659_v30 }
 0x105   :  { %v309_v33 = vpop.f32.mrf.mxu0  ;;  %v349_v34 = vpop.f32.mrf.mxu1 }
 0x106   :  { %v652_v35 = vpack.c.bf16 %v309_v33, %v307_v31  ;;  %v660_v36 = vpack.c.bf16 %v349_v34, %v347_v32 }
 0x107   :  { %v313_v37 = vpop.f32.mrf.mxu0  ;;  %v353_v38 = vpop.f32.mrf.mxu1 }
 0x108   :  { %578 = vst [vmem:[#allocation8 + $0x8] sm:$0xff] %v652_v35  ;;  %586 = vst [vmem:[#allocation8 + $0x48] sm:$0xff] %v660_v36 }
 0x109   :  { %v315_v39 = vpop.f32.mrf.mxu0  ;;  %v355_v40 = vpop.f32.mrf.mxu1 }
 0x10a   :  { %v653_v41 = vpack.c.bf16 %v315_v39, %v313_v37  ;;  %v661_v42 = vpack.c.bf16 %v355_v40, %v353_v38 }
 0x10b   :  { %v317_v43 = vpop.f32.mrf.mxu0  ;;  %v357_v44 = vpop.f32.mrf.mxu1 }
 0x10c   :  { %579 = vst [vmem:[#allocation8 + $0x10] sm:$0xff] %v653_v41  ;;  %587 = vst [vmem:[#allocation8 + $0x50] sm:$0xff] %v661_v42 }
 0x10d   :  { %v319_v45 = vpop.f32.mrf.mxu0  ;;  %v359_v46 = vpop.f32.mrf.mxu1 }
 0x10e   :  { %v654_v47 = vpack.c.bf16 %v319_v45, %v317_v43  ;;  %v662_v48 = vpack.c.bf16 %v359_v46, %v357_v44 }
 0x10f   :  { %v323_v49 = vpop.f32.mrf.mxu0  ;;  %v363_v50 = vpop.f32.mrf.mxu1 }
 0x110   :  { %580 = vst [vmem:[#allocation8 + $0x18] sm:$0xff] %v654_v47  ;;  %588 = vst [vmem:[#allocation8 + $0x58] sm:$0xff] %v662_v48 }
 0x111   :  { %v325_v51 = vpop.f32.mrf.mxu0  ;;  %v365_v52 = vpop.f32.mrf.mxu1 }
 0x112   :  { %v655_v53 = vpack.c.bf16 %v325_v51, %v323_v49  ;;  %v663_v54 = vpack.c.bf16 %v365_v52, %v363_v50 }
 0x113   :  { %v327_v55 = vpop.f32.mrf.mxu0  ;;  %v367_v56 = vpop.f32.mrf.mxu1 }
 0x114   :  { %581 = vst [vmem:[#allocation8 + $0x20] sm:$0xff] %v655_v53  ;;  %589 = vst [vmem:[#allocation8 + $0x60] sm:$0xff] %v663_v54 }
 0x115   :  { %v329_v57 = vpop.f32.mrf.mxu0  ;;  %v369_v58 = vpop.f32.mrf.mxu1 }
 0x116   :  { %v656_v59 = vpack.c.bf16 %v329_v57, %v327_v55  ;;  %v664_v60 = vpack.c.bf16 %v369_v58, %v367_v56 }
 0x117   :  { %v333_v61 = vpop.f32.mrf.mxu0  ;;  %v373_v62 = vpop.f32.mrf.mxu1 }
 0x118   :  { %582 = vst [vmem:[#allocation8 + $0x28] sm:$0xff] %v656_v59  ;;  %590 = vst [vmem:[#allocation8 + $0x68] sm:$0xff] %v664_v60 }
 0x119   :  { %v335_v63 = vpop.f32.mrf.mxu0  ;;  %v375_v0 = vpop.f32.mrf.mxu1 }
 0x11a   :  { %v657_v1 = vpack.c.bf16 %v335_v63, %v333_v61  ;;  %v665_v2 = vpack.c.bf16 %v375_v0, %v373_v62 }
 0x11b   :  { %v337_v3 = vpop.f32.mrf.mxu0  ;;  %v377_v4 = vpop.f32.mrf.mxu1 }
 0x11c   :  { %583 = vst [vmem:[#allocation8 + $0x30] sm:$0xff] %v657_v1  ;;  %591 = vst [vmem:[#allocation8 + $0x70] sm:$0xff] %v665_v2 }
 0x11d   :  { %v339_v5 = vpop.f32.mrf.mxu0  ;;  %v379_v6 = vpop.f32.mrf.mxu1 }
 0x11e   :  { %v658_v7 = vpack.c.bf16 %v339_v5, %v337_v3  ;;  %v666_v8 = vpack.c.bf16 %v379_v6, %v377_v4 }
 0x120   :  { %584 = vst [vmem:[#allocation8 + $0x38] sm:$0xff] %v658_v7  ;;  %592 = vst [vmem:[#allocation8 + $0x78] sm:$0xff] %v666_v8 }
 0x121   :  { %774 = shalt.err (!%p771_p0)
}
 0x122   :  { %604 = dma.vmem_to_hbm [thread:$0]  %s599_s1, 2048, %s837_s2, [#allocation5], %s793_s19, %s793_s19, %s794_s20  }
 0x123   :  { %787 = dma.done.wait [#allocation5], 2048  }
 0x124   :  { %788 = vsyncadd [#allocation5], 4294965248 }
 0x125   :  { %608 = vsyncpa [#allocation4], 1 }
 0x126   :  { %609 = vsyncpa [#allocation7], 1 }
 0x127   :  { %610 = vsyncpa [#allocation5], 1 }

</bundles_post_ra>
